<compile_context>
chip_gen: v5e
topology: v5e:2x2
jax: 0.10.0
libtpu: 0.0.40
codegen_flags: <defaults>
</compile_context>

<pallas_src>
import functools

import jax
import jax.numpy as jnp
from jax.experimental import pallas as pl
from jax.experimental.pallas import tpu as pltpu


def _round_up(x: int, m: int) -> int:
    return ((x + m - 1) // m) * m


def _cdiv(a: int, b: int) -> int:
    return -(-a // b)


def _triplet_loss_kernel(margin_ref, a_ref, p_ref, n_ref, o_ref,
                         *, batch: int, block_rows: int, blocks_per_core: int):
    c = pl.program_id(0)   # core / parallel axis
    j = pl.program_id(1)   # per-core batch-block axis (reduction)

    @pl.when(j == 0)
    def _():
        o_ref[...] = jnp.zeros_like(o_ref)

    a = a_ref[...].astype(jnp.float32)
    p = p_ref[...].astype(jnp.float32)
    n = n_ref[...].astype(jnp.float32)

    dp = a - p
    dn = a - n
    # Fold the difference of squared distances before a single lane reduce.
    diff = dp * dp - dn * dn                              # (TB, D)
    per_row = jnp.sum(diff, axis=1, keepdims=True)        # (TB, 1)

    hinge = jnp.maximum(per_row + margin_ref[0], 0.0)     # (TB, 1)

    # Mask rows that fall outside the true batch (partial last block and any
    # duplicated/clamped blocks on the uneven core split).
    row = (c * blocks_per_core + j) * block_rows + \
          jax.lax.broadcasted_iota(jnp.int32, hinge.shape, 0)
    hinge = jnp.where(row < batch, hinge, 0.0)

    # (1,1) block sum broadcast-accumulated into this core's (8,128) out tile.
    o_ref[...] += jnp.sum(hinge, keepdims=True)


def triplet_loss(anchor: jax.Array,
                 positive: jax.Array,
                 negative: jax.Array,
                 margin: float = 1.0,
                 *,
                 block_rows: int | None = None) -> jax.Array:
    """Pallas TPU implementation of TripletLoss.forward. Returns a scalar."""
    assert anchor.shape == positive.shape == negative.shape
    assert anchor.ndim == 2, "expected (batch, features) inputs"
    B, D = anchor.shape
    itemsize = anchor.dtype.itemsize
    num_cores = 2  # v7x megacore split; runs sequentially (cheaply) on v5e/v6e.

    # Block rows: ~2 MiB per input block, capped at 2048 rows (diminishing
    # returns past ~512-row-class tiles for a streaming kernel).
    if block_rows is None:
        tb = (2 * 1024 * 1024) // max(D * itemsize, 1)
        tb = max(8, (tb // 8) * 8)
        tb = min(tb, 2048)
    else:
        tb = max(8, (block_rows // 8) * 8)
    tb = min(tb, _round_up(B, 8))

    total_blocks = _cdiv(B, tb)
    blocks_per_core = _cdiv(total_blocks, num_cores)
    grid = (num_cores, blocks_per_core)

    def in_map(c, j, _margin):
        # Clamp so every DMA stays in bounds; surplus rows are masked in-kernel.
        blk = jnp.minimum(c * blocks_per_core + j, total_blocks - 1)
        return (blk, 0)

    in_spec = pl.BlockSpec((tb, D), in_map)

    kernel = functools.partial(_triplet_loss_kernel, batch=B, block_rows=tb,
                               blocks_per_core=blocks_per_core)

    margin_arr = jnp.asarray([margin], dtype=jnp.float32)

    out = pl.pallas_call(
        kernel,
        out_shape=jax.ShapeDtypeStruct((num_cores * 8, 128), jnp.float32),
        grid_spec=pltpu.PrefetchScalarGridSpec(
            num_scalar_prefetch=1,
            grid=grid,
            in_specs=[in_spec, in_spec, in_spec],
            out_specs=pl.BlockSpec((8, 128), lambda c, j, m: (c, 0)),
        ),
        compiler_params=pltpu.CompilerParams(
            dimension_semantics=("parallel", "arbitrary"),
            vmem_limit_bytes=32 * 1024 * 1024,
        ),
        cost_estimate=pl.CostEstimate(
            flops=7 * B * D,
            transcendentals=0,
            bytes_accessed=3 * B * D * itemsize + num_cores * 8 * 128 * 4,
        ),
    )(margin_arr, anchor, positive, negative)

    # Every element of a core's (8,128) tile holds that core's partial sum.
    partials = out.reshape(num_cores, 8, 128)[:, 0, 0]
    return jnp.sum(partials) / B


def _reference(anchor, positive, negative, margin=1.0):
    a = anchor.astype(jnp.float32)
    p = positive.astype(jnp.float32)
    n = negative.astype(jnp.float32)
    dp = jnp.sum((a - p) ** 2, axis=1)
    dn = jnp.sum((a - n) ** 2, axis=1)
    return jnp.mean(jnp.maximum(dp - dn + margin, 0.0))


if __name__ == "__main__":
    key = jax.random.PRNGKey(0)
    keys = jax.random.split(key, 9)

    # Case 1: small aligned shape consistent with (batch, embedding_dim).
    B, D = 8, 32
    anchor = jax.random.normal(keys[0], (B, D), dtype=jnp.float32)
    positive = jax.random.normal(keys[1], (B, D), dtype=jnp.float32)
    negative = jax.random.normal(keys[2], (B, D), dtype=jnp.float32)
    loss = jax.block_until_ready(triplet_loss(anchor, positive, negative, margin=1.0))
    ref = _reference(anchor, positive, negative, margin=1.0)
    assert jnp.allclose(loss, ref, rtol=1e-5, atol=1e-5), (loss, ref)

    # Case 2: batch / feature dims not aligned to (8, 128) — exercises the
    # partial-block row mask and the non-128 feature reduce.
    B2, D2 = 10, 48
    a2 = jax.random.normal(keys[3], (B2, D2), dtype=jnp.float32)
    p2 = jax.random.normal(keys[4], (B2, D2), dtype=jnp.float32)
    n2 = jax.random.normal(keys[5], (B2, D2), dtype=jnp.float32)
    loss2 = jax.block_until_ready(triplet_loss(a2, p2, n2, margin=0.5))
    ref2 = _reference(a2, p2, n2, margin=0.5)
    assert jnp.allclose(loss2, ref2, rtol=1e-5, atol=1e-5), (loss2, ref2)

    # Case 3: multiple batch blocks split across the two "cores" of the
    # parallel axis (forced small block_rows), plus native bf16 inputs.
    B3, D3 = 200, 40
    a3 = jax.random.normal(keys[6], (B3, D3), dtype=jnp.bfloat16)
    p3 = jax.random.normal(keys[7], (B3, D3), dtype=jnp.bfloat16)
    n3 = jax.random.normal(keys[8], (B3, D3), dtype=jnp.bfloat16)
    loss3 = jax.block_until_ready(triplet_loss(a3, p3, n3, margin=0.2, block_rows=64))
    ref3 = _reference(a3, p3, n3, margin=0.2)
    assert jnp.allclose(loss3, ref3, rtol=1e-4, atol=1e-4), (loss3, ref3)

    print("KERNEL_OK")
</pallas_src>

<mosaic_0001>
module attributes {stable_mosaic.version = 11 : i64} {
  func.func @_triplet_loss_kernel(%arg0: i32, %arg1: i32, %arg2: memref<1xf32, #tpu.memory_space<smem>>, %arg3: memref<8x32xf32, #tpu.memory_space<vmem>>, %arg4: memref<8x32xf32, #tpu.memory_space<vmem>>, %arg5: memref<8x32xf32, #tpu.memory_space<vmem>>, %arg6: memref<8x128xf32, #tpu.memory_space<vmem>>) attributes {dimension_semantics = [#tpu.dimension_semantics<parallel>, #tpu.dimension_semantics<arbitrary>], iteration_bounds = array<i64: 2, 1>, scalar_prefetch = 1 : i64, scratch_operands = 0 : i64, tpu.core_type = #tpu.core_type<tc>, window_params = [{transform_indices = @transform_0, window_bounds = array<i64: 8, 32>}, {transform_indices = @transform_1, window_bounds = array<i64: 8, 32>}, {transform_indices = @transform_2, window_bounds = array<i64: 8, 32>}, {transform_indices = @transform_3, window_bounds = array<i64: 8, 128>}]} {
    %c0_i32 = arith.constant 0 : i32
    %0 = arith.cmpi eq, %arg1, %c0_i32 : i32
    %1 = arith.extui %0 : i1 to i32
    %c0_i32_0 = arith.constant 0 : i32
    %2 = arith.cmpi ne, %1, %c0_i32_0 : i32
    scf.if %2 {
      %cst_15 = arith.constant 0.000000e+00 : f32
      %37 = vector.broadcast %cst_15 : f32 to vector<8x128xf32>
      %c0_16 = arith.constant 0 : index
      %c0_17 = arith.constant 0 : index
      %38 = vector.load %arg6[%c0_16, %c0_17] : memref<8x128xf32, #tpu.memory_space<vmem>>, vector<8x128xf32>
      tpu.vector_store %arg6[%c0_16, %c0_17], %37 {strides = array<i32>} : memref<8x128xf32, #tpu.memory_space<vmem>>, vector<8x128xf32>,
    } else {
    }
    %c0 = arith.constant 0 : index
    %c0_1 = arith.constant 0 : index
    %3 = vector.load %arg3[%c0, %c0_1] : memref<8x32xf32, #tpu.memory_space<vmem>>, vector<8x32xf32>
    %c0_2 = arith.constant 0 : index
    %c0_3 = arith.constant 0 : index
    %4 = vector.load %arg4[%c0_2, %c0_3] : memref<8x32xf32, #tpu.memory_space<vmem>>, vector<8x32xf32>
    %c0_4 = arith.constant 0 : index
    %c0_5 = arith.constant 0 : index
    %5 = vector.load %arg5[%c0_4, %c0_5] : memref<8x32xf32, #tpu.memory_space<vmem>>, vector<8x32xf32>
    %6 = arith.subf %3, %4 : vector<8x32xf32>
    %7 = arith.subf %3, %5 : vector<8x32xf32>
    %8 = arith.mulf %6, %6 : vector<8x32xf32>
    %9 = arith.mulf %7, %7 : vector<8x32xf32>
    %10 = arith.subf %8, %9 : vector<8x32xf32>
    %cst = arith.constant dense<0.000000e+00> : vector<8xf32>
    %11 = vector.multi_reduction <add>, %10, %cst [1] : vector<8x32xf32> to vector<8xf32>
    %12 = vector.shape_cast %11 : vector<8xf32> to vector<8x1xf32>
    %c0_6 = arith.constant 0 : index
    %13 = memref.load %arg2[%c0_6] : memref<1xf32, #tpu.memory_space<smem>>
    %14 = vector.broadcast %13 : f32 to vector<8x1xf32>
    %15 = arith.addf %12, %14 : vector<8x1xf32>
    %cst_7 = arith.constant 0.000000e+00 : f32
    %16 = vector.broadcast %cst_7 : f32 to vector<8x1xf32>
    %17 = arith.maximumf %15, %16 : vector<8x1xf32>
    %c1_i32 = arith.constant 1 : i32
    %18 = arith.muli %arg0, %c1_i32 : i32
    %19 = arith.addi %18, %arg1 : i32
    %c8_i32 = arith.constant 8 : i32
    %20 = arith.muli %19, %c8_i32 : i32
    %21 = tpu.iota {dimensions = array<i32: 0>} : vector<8x1xi32>
    %22 = vector.broadcast %20 : i32 to vector<8x1xi32>
    %23 = arith.addi %22, %21 : vector<8x1xi32>
    %c8_i32_8 = arith.constant 8 : i32
    %24 = vector.broadcast %c8_i32_8 : i32 to vector<8x1xi32>
    %25 = arith.cmpi slt, %23, %24 : vector<8x1xi32>
    %cst_9 = arith.constant 0.000000e+00 : f32
    %26 = vector.broadcast %cst_9 : f32 to vector<8x1xf32>
    %27 = arith.select %25, %17, %26 : vector<8x1xi1>, vector<8x1xf32>
    %c0_10 = arith.constant 0 : index
    %c0_11 = arith.constant 0 : index
    %28 = vector.load %arg6[%c0_10, %c0_11] : memref<8x128xf32, #tpu.memory_space<vmem>>, vector<8x128xf32>
    %29 = vector.shape_cast %27 : vector<8x1xf32> to vector<1x8x1xf32>
    %cst_12 = arith.constant dense<0.000000e+00> : vector<1xf32>
    %30 = vector.multi_reduction <add>, %29, %cst_12 [1, 2] : vector<1x8x1xf32> to vector<1xf32>
    %31 = vector.shape_cast %30 : vector<1xf32> to vector<1x1x1xf32>
    %32 = vector.extract %31[0, 0, 0] : f32 from vector<1x1x1xf32>
    %33 = vector.broadcast %32 : f32 to vector<1x1xf32>
    %34 = vector.broadcast %33 : vector<1x1xf32> to vector<8x128xf32>
    %35 = arith.addf %28, %34 : vector<8x128xf32>
    %c0_13 = arith.constant 0 : index
    %c0_14 = arith.constant 0 : index
    %36 = vector.load %arg6[%c0_13, %c0_14] : memref<8x128xf32, #tpu.memory_space<vmem>>, vector<8x128xf32>
    tpu.vector_store %arg6[%c0_13, %c0_14], %35 {strides = array<i32>} : memref<8x128xf32, #tpu.memory_space<vmem>>, vector<8x128xf32>,
    return
  }
  func.func @transform_0(%arg0: i32, %arg1: i32, %arg2: memref<1xf32, #tpu.memory_space<smem>>) -> (i32, i32) {
    %c1_i32 = arith.constant 1 : i32
    %0 = arith.muli %arg0, %c1_i32 : i32
    %1 = arith.addi %0, %arg1 : i32
    %c0_i32 = arith.constant 0 : i32
    %2 = arith.minsi %1, %c0_i32 : i32
    %c0_i32_0 = arith.constant 0 : i32
    %c0_i32_1 = arith.constant 0 : i32
    return %2, %c0_i32_0 : i32, i32
  }
  func.func @transform_1(%arg0: i32, %arg1: i32, %arg2: memref<1xf32, #tpu.memory_space<smem>>) -> (i32, i32) {
    %c1_i32 = arith.constant 1 : i32
    %0 = arith.muli %arg0, %c1_i32 : i32
    %1 = arith.addi %0, %arg1 : i32
    %c0_i32 = arith.constant 0 : i32
    %2 = arith.minsi %1, %c0_i32 : i32
    %c0_i32_0 = arith.constant 0 : i32
    %c0_i32_1 = arith.constant 0 : i32
    return %2, %c0_i32_0 : i32, i32
  }
  func.func @transform_2(%arg0: i32, %arg1: i32, %arg2: memref<1xf32, #tpu.memory_space<smem>>) -> (i32, i32) {
    %c1_i32 = arith.constant 1 : i32
    %0 = arith.muli %arg0, %c1_i32 : i32
    %1 = arith.addi %0, %arg1 : i32
    %c0_i32 = arith.constant 0 : i32
    %2 = arith.minsi %1, %c0_i32 : i32
    %c0_i32_0 = arith.constant 0 : i32
    %c0_i32_1 = arith.constant 0 : i32
    return %2, %c0_i32_0 : i32, i32
  }
  func.func @transform_3(%arg0: i32, %arg1: i32, %arg2: memref<1xf32, #tpu.memory_space<smem>>) -> (i32, i32) {
    %c0_i32 = arith.constant 0 : i32
    %c0_i32_0 = arith.constant 0 : i32
    return %arg0, %c0_i32 : i32, i32
  }
}

</mosaic_0001>

<bundles_post_ra>
// kernel: tpu_custom_call.1
= control target key start
LH: loop header
LB: loop body
LE: loop exit
PB: predicated region body
PF: predicated region fallthrough
CT: control target
= control target key end

     0   :  { %s1030_s0 = inlined_call_operand.<no memory space> [shape: f32[1], index: 0, kind: input, shape index: {}]   ;;  %s1031_s1 = inlined_call_operand.hbm [shape: f32[8,32], index: 1, kind: input, shape index: {}]   ;;  %s1032_s2 = inlined_call_operand.hbm [shape: f32[8,32], index: 2, kind: input, shape index: {}]   ;;  %s1033_s3 = inlined_call_operand.hbm [shape: f32[8,32], index: 3, kind: input, shape index: {}]   ;;  %s1034_s4 = inlined_call_operand.hbm [shape: f32[16,128], index: 4, kind: output, shape index: {}]  }
   0x1   :  { %1036 = sst [smem:[#allocation15_spill]] %s1032_s2 }
   0x2   :  { %9 = sst [smem:[#allocation3]] %s1030_s0 }
   0x3   :  { %10 = vsyncpa [#allocation5], 0 }
   0x4   :  { %12 = vsyncpa [#allocation5 + $0x1], 0 }
   0x5   :  { %13 = vsyncpa [#allocation8], 0 }
   0x6   :  { %15 = vsyncpa [#allocation8 + $0x1], 0 }
   0x7   :  { %16 = vsyncpa [#allocation6], 0 }
   0x8   :  { %18 = vsyncpa [#allocation6 + $0x1], 0  ;;  %s843_s17 = smov 0   ;;  %s845_s18 = smov 0  }
   0x9   :  { %s847_s19 = smov 0   ;;  %s849_s20 = smov 0  }
   0xa   :  { %s851_s21 = smov 0   ;;  %s853_s22 = smov 0  }
   0xb   :  { %s855_s23 = smov 0   ;;  %s857_s0 = smov 0  }
   0xc LB: > { %s882_s24 = sadd.s32 4294967295, %s810_s0   ;;  %s495_s25 = sadd.s32 4294967294, %s810_s0   ;;  %s810_s0 = sphi %s857_s0, %s24_s0   ;;  %s806_s23 = sphi %s855_s23, %s1051_s23   ;;  %s802_s22 = sphi %s853_s22, %s1050_s22   ;;  %s798_s21 = sphi %s851_s21, %s1020_s21   ;;  %s794_s20 = sphi %s849_s20, %s1049_s20   ;;  %s790_s19 = sphi %s847_s19, %s1048_s19   ;;  %s786_s18 = sphi %s845_s18, %s1047_s18   ;;  %s782_s17 = sphi %s843_s17, %s1046_s17  }
   0xd   : > { %s36_s26 = sadd.s32 1, %s806_s23  ;;  %p779_p1 = scmp.ne.s32.totalorder %s798_s21, 0 }
   0xe   : > { %p38_p0 = scmp.ge.s32.totalorder %s36_s26, 2  ;;  %p57_p2 = scmp.eq.s32.totalorder %s810_s0, 0 }
   0xf   : > { %p62_p3 = scmp.ne.s32.totalorder %s798_s21, %s794_s20  ;;  %p63_p5 = scmp.eq.s32.totalorder %s882_s24, 0 }
  0x10   : > { %s1053_s26 = smov (%p38_p0, %s36_s26), 0  ;;  %p891_p4 = por %p779_p1, %p57_p2 }
  0x11   : > { %1037 = sst [smem:[#allocation14_spill]] %s1053_s26  ;;  %p896_p6 = por %p63_p5, %p62_p3 }
  0x12   : > { %s136_s29 = ssub.s32 %s806_s23, %s1053_s26  ;;  %s139_s30 = sadd.s32 1, %s790_s19 }
  0x13   : > { %p137_p7 = scmp.eq.s32.totalorder %s136_s29, 0  ;;  %p149_p8 = scmp.ne.s32.totalorder %s790_s19, %s786_s18 }
  0x14   : > { %p150_p9 = scmp.eq.s32.totalorder %s882_s24, 1  ;;  %p155_p10 = scmp.ne.s32.totalorder %s786_s18, %s782_s17 }
  0x15   : > { %s904_s5 = scalar_select %p137_p7, %s790_s19, %s139_s30  }
  0x16   : > { %p156_p11 = scmp.eq.s32.totalorder %s495_s25, 1  ;;  %p911_p12 = por %p150_p9, %p149_p8 }
  0x17   : > { %p497_p13 = scmp.ge.s32.totalorder %s810_s0, 2  ;;  %p538_p1 = scmp.lt.s32.totalorder %s810_s0, 2 }
  0x18   : > { %p916_p0 = por %p156_p11, %p155_p10  ;;  %s198_s9 = sand.u32 1, %s810_s0  }
  0x19   : > { %p923_p2 = pnand %p538_p1, %p891_p4  ;;  %s812_s10 = smov [#allocation7]  }
  0x1a   : > { %s213_s11 = sshll.u32 %s812_s10, 4  ;;  %s1043_s2 = sld [smem:[#allocation15_spill]]  ;;  %s214_s11 = int_to_ptr.vmem [resolvable:$true] %s213_s11 }
  0x1b   : > { %p504_p3 = scmp.ge.s32.totalorder %s810_s0, 1  ;;  %s932_s15 = scalar_lea.sflag [#allocation8], %s198_s9 }
  0x1c   : > { %p617_p5 = pneg %p923_p2 }
  0x20   : > { %s211_s14 = sshll.u32 %s1043_s2, 4  ;;  %s620_s29 = scalar_lea.hbm %s1043_s2, 8  ;;  %s212_s14 = int_to_ptr.hbm [resolvable:$true] %s211_s14 }
  0x21   : > { %s613_s16 = sshra.s32 %s212_s14, 4  ;;  %s614_s16 = int_to_ptr.hbm [resolvable:$true] %s613_s16 }
  0x22   : > { %s615_s20 = scalar_lea.hbm %s614_s16, 8 }
  0x23   : > { %p616_p4 = scmp.ne.s32.totalorder %s614_s16, %s615_s20  ;;  %p622_p9 = scmp.lt.s32.totalorder %s620_s29, %s615_s20 }
  0x25   : > { %p618_p7 = pnand %p617_p5, %p616_p4 }
  0x27   : > { %p619_p8 = pneg %p618_p7 }
  0x29   : > { %p624_p10 = pnand %p622_p9, %p619_p8 }
  0x2b   : > { %627 = shalt.err (!%p624_p10)
}
  0x2c   : > { %530 = dma.hbm_to_vmem [thread:$0]  (!%p923_p2), %s212_s14, 128, %s214_s11, %s932_s15  }
  0x2d   : > { %p240_p11 = scmp.lt.s32.totalorder %s810_s0, 3  ;;  %s813_s9 = smov [#allocation4]  }
  0x2e   : > { %s191_s10 = sshll.u32 %s813_s9, 4  ;;  %s189_s16 = sshll.u32 %s1031_s1, 4  ;;  %s192_s10 = int_to_ptr.vmem [resolvable:$true] %s191_s10  ;;  %s190_s16 = int_to_ptr.hbm [resolvable:$true] %s189_s16 }
  0x2f   : > { %p948_p1 = pnand %p504_p3, %p240_p11  ;;  %s643_s20 = sshra.s32 %s190_s16, 4  ;;  %s644_s20 = int_to_ptr.hbm [resolvable:$true] %s643_s20 }
  0x30   : > { %s645_s25 = scalar_lea.hbm %s644_s20, 8  ;;  %s650_s27 = scalar_lea.hbm %s1031_s1, 8 }
  0x31   : > { %p646_p4 = scmp.ne.s32.totalorder %s644_s20, %s645_s25  ;;  %p652_p3 = scmp.lt.s32.totalorder %s650_s27, %s645_s25 }
  0x33   : > { %p648_p7 = pnand %p646_p4, %p617_p5 }
  0x35   : > { %p649_p8 = pneg %p648_p7 }
  0x37   : > { %p654_p9 = pnand %p652_p3, %p649_p8 }
  0x39   : > { %657 = shalt.err (!%p654_p9)
}
  0x3a   : > { %527 = dma.hbm_to_vmem [thread:$0]  (!%p923_p2), %s190_s16, 128, %s192_s10, [#allocation5]  }
  0x3b   : > { %s814_s29 = smov [#allocation9]   ;;  %s233_s20 = sshll.u32 %s1033_s3, 4  ;;  %s234_s20 = int_to_ptr.hbm [resolvable:$true] %s233_s20 }
  0x3c   : > { %s235_s9 = sshll.u32 %s814_s29, 4  ;;  %s673_s2 = sshra.s32 %s234_s20, 4  ;;  %s236_s9 = int_to_ptr.vmem [resolvable:$true] %s235_s9  ;;  %s674_s2 = int_to_ptr.hbm [resolvable:$true] %s673_s2 }
  0x3d   : > { %s675_s26 = scalar_lea.hbm %s674_s2, 8  ;;  %s680_s10 = scalar_lea.hbm %s1033_s3, 8 }
  0x3e   : > { %p676_p10 = scmp.ne.s32.totalorder %s674_s2, %s675_s26  ;;  %p682_p7 = scmp.lt.s32.totalorder %s680_s10, %s675_s26 }
  0x40   : > { %p678_p11 = pnand %p676_p10, %p617_p5 }
  0x42   : > { %p679_p4 = pneg %p678_p11 }
  0x44   : > { %p684_p8 = pnand %p682_p7, %p679_p4 }
  0x46   : > { %687 = shalt.err (!%p684_p8)
}
  0x47   : > { %533 = dma.hbm_to_vmem [thread:$0]  (!%p923_p2), %s234_s20, 128, %s236_s9, %s932_s15  }
  0x48   : > { %244 = sbr.rel (%p948_p1) target bundleno = 394 (0x18a), region = 32  ;;  %s246_s2 = sand.u32 (!%p948_p1), 1, %s798_s21  }
  0x49   : > { %s505_s16 = sshll.u32 (!%p948_p1), %s246_s2, 3  ;;  %s247_s14 = scalar_lea.sflag (!%p948_p1), [#allocation5], %s246_s2 }
  0x4a   : > { %s250_s27 = scalar_lea.vmem (!%p948_p1), [#allocation4], %s505_s16 }
  0x4d   : > { %768 = dma.done.wait (%p896_p6), %s247_s14, 128  }
  0x4e   : > { %770 = vsyncadd (%p896_p6), %s247_s14, 4294967168  ;;  %s256_s26 = sand.u32 1, %s882_s24   ;;  %s260_s29 = scalar_lea.vmem [#allocation7], %s505_s16 }
  0x4f   : > { %s257_s8 = scalar_lea.sflag [#allocation8], %s256_s26 }
  0x50   : > { %772 = dma.done.wait (%p896_p6), %s257_s8, 256  }
  0x51   : > { %774 = vsyncadd (%p896_p6), %s257_s8, 4294967040  ;;  %v318_v0 = vld [vmem:[%s250_s27] sm:$0xff]  ;;  %v319_v1 = vld [vmem:[%s260_s29] sm:$0xff]  ;;  %s270_s15 = scalar_lea.vmem [#allocation9], %s505_s16  ;;  %vm326_vm0 = vcmask 261120   ;;  %s330_s24 = sld [smem:[#allocation3]]  ;;  %v336_v9 = vlaneseq }
  0x52   : > { %v320_v2 = vld [vmem:[%s270_s15] sm:$0xff]  ;;  %v321_v3 = vsub.f32 %v318_v0, %v319_v1  ;;  %s509_s30 = sshll.u32 %s802_s22, 3  ;;  %vm343_vm2 = vcmask 7168   ;;  %s301_s22 = sand.u32 1, %s786_s18  }
  0x53   : > { %v322_v4 = vsub.f32 %v318_v0, %v320_v2  ;;  %v337_v10 = vshrl.u32 %v336_v9, 7  ;;  %v338_v11 = vstv %s509_s30  ;;  %s508_s28 = sshll.u32 %s301_s22, 3  ;;  %s368_s13 = scalar_lea.hbm %s1034_s4, %s509_s30 }
  0x54   : > { %v323_v5 = vmul.f32 %v321_v3, %v321_v3  ;;  %s303_s20 = scalar_lea.vmem [#allocation10], %s508_s28  ;;  %s372_s11 = sshll.u32 %s368_s13, 4  ;;  %s373_s11 = int_to_ptr.hbm [resolvable:$true] %s372_s11 }
  0x55   : > { %v324_v6 = vmul.f32 %v322_v4, %v322_v4  ;;  %v339_v13 = vadd.s32 %v338_v11, %v337_v10  ;;  %s370_s25 = sshll.u32 %s303_s20, 4  ;;  %s358_s2 = scalar_lea.sflag [#allocation6], %s301_s22  ;;  %s371_s25 = int_to_ptr.vmem [resolvable:$true] %s370_s25 }
  0x56   : > { %s717_s16 = sshra.s32 %s373_s11, 4  ;;  %s723_s8 = scalar_lea.hbm %s1034_s4, 16  ;;  %s718_s16 = int_to_ptr.hbm [resolvable:$true] %s717_s16 }
  0x57   : > { %v325_v7 = vsub.f32 %v323_v5, %v324_v6  ;;  %v331_v12 = vstv %s330_s24  ;;  %vm340_vm1 = vcmp.lt.s32.totalorder %v339_v13, 8  ;;  %s719_s14 = scalar_lea.hbm %s718_s16, 8  ;;  %p724_p1 = scmp.lt.s32.totalorder %s718_s16, %s1034_s4 }
  0x58   : > { %p720_p6 = scmp.ne.s32.totalorder %s718_s16, %s719_s14  ;;  %p725_p3 = scmp.lt.s32.totalorder %s723_s8, %s719_s14 }
  0x59   : > { %v327_v8 = vsel %vm326_vm0, %v325_v7, 0.0 }
  0x5a   : > { %328 = vadd.xlane.f32.xlu0 %v327_v8  ;;  %p721_p2 = pnand %p720_p6, %p911_p12  ;;  %p726_p9 = por %p725_p3, %p724_p1 }
  0x5c   : > { %p722_p5 = pneg %p721_p2 }
  0x5e   : > { %p727_p10 = pnand %p726_p9, %p722_p5 }
  0xcd   : > { %v329_v14 = vpop.xlane.xlu0 %328 }
  0xce   : > { %v332_v15 = vadd.f32 %v331_v12, %v329_v14 }
  0xd0   : > { %v333_v16 = vmax.f32 %v332_v15, 0.0 }
  0xd2   : > { %v341_v17 = vsel %vm340_vm1, %v333_v16, 0.0 }
  0xd3   : > { %v344_v18 = vsel %vm343_vm2, %v341_v17, 0.0 }
  0xd4   : > { %345 = vadd.xlane.f32.xlu0 %v344_v18 }
 0x147   : > { %v346_v19 = vpop.xlane.xlu0 %345 }
 0x148   : > { %v347_v20 = vrot.slane %v346_v19, 4 }
 0x14a   : > { %v348_v21 = vadd.f32 %v347_v20, %v346_v19 }
 0x14c   : > { %v349_v22 = vrot.slane %v348_v21, 2 }
 0x14e   : > { %v350_v23 = vadd.f32 %v349_v22, %v348_v21 }
 0x150   : > { %v351_v24 = vrot.slane %v350_v23, 1 }
 0x152   : > { %v352_v25 = vadd.f32 %v351_v24, %v350_v23 }
 0x154   : > { %514 = vpush %v352_v25 }
 0x185   : > { %s515_s10 = spop %514 }
 0x186   : > { %v354_v26 = vstv %s515_s10 }
 0x187   : > { %356 = vst [vmem:[%s303_s20] sm:$0xff] %v354_v26 }
 0x188   : > { %730 = shalt.err (!%p727_p10)
}
 0x189   : > { %522 = dma.vmem_to_hbm [thread:$0]  (%p911_p12), %s371_s25, 128, %s373_s11, %s358_s2  }
 0x18a PF: > { %s384_s24 = sand.u32 1, %s782_s17   ;;  %p535_p11 = pnand %p497_p13, %p916_p0 }
 0x18b   : > { %s385_s30 = scalar_lea.sflag [#allocation6], %s384_s24 }
 0x18c   : > { %p536_p4 = pneg %p535_p11 }
 0x18e   : > { %776 = dma.done.wait (%p536_p4), %s385_s30, 128  }
 0x18f   : > { %778 = vsyncadd (%p536_p4), %s385_s30, 4294967168  ;;  %s24_s0 = sadd.s32 1, %s810_s0   ;;  %s1045_s6 = sld [smem:[#allocation14_spill]] }
 0x190   : > { %p21_p7 = scmp.ge.s32.totalorder %s24_s0, 4   ;;  %s1046_s17 = smov %s786_s18 }
 0x191   : > { %s1047_s18 = smov %s790_s19  ;;  %s1048_s19 = smov %s904_s5 }
 0x192   : > { %s1049_s20 = smov %s798_s21  ;;  %s1020_s21 = smov 0  }
 0x193   : > { %s1050_s22 = smov %s806_s23  ;;  %23 = sbr.rel (!%p21_p7) target bundleno = 12 (0xc), region = 105 }
 0x195   : > { %s1051_s23 = smov %s1045_s6 }
 0x198   :  { %391 = vsyncpa [#allocation5], 1 }
 0x199   :  { %393 = vsyncpa [#allocation5 + $0x1], 1 }
 0x19a   :  { %394 = vsyncpa [#allocation8], 1 }
 0x19b   :  { %396 = vsyncpa [#allocation8 + $0x1], 1 }
 0x19c   :  { %397 = vsyncpa [#allocation6], 1 }
 0x19d   :  { %399 = vsyncpa [#allocation6 + $0x1], 1 }

</bundles_post_ra>
